<compile_context>
chip_gen: v7x
topology: tpu7x:2x2x1
jax: 0.10.0
libtpu: 0.0.40
codegen_flags: <defaults>
</compile_context>

<pallas_src>
import functools

import jax
import jax.numpy as jnp
import numpy as np
from jax import lax
from jax.experimental import pallas as pl
from jax.experimental.pallas import tpu as pltpu


def _row0(cr):
    """Sublane-aligned start row of the w2/b2/bias section in the packed params."""
    return max(8, ((cr + 7) // 8) * 8)


def pack_se_params(w1, b1, w2, b2, se_bias):
    """Pack the five tiny SE parameters into ONE 2-D buffer (single DMA into the kernel).

    Layout (rows x cols), r0 = sublane-aligned offset >= Cr:
      [0:Cr,    0:C ] = w1       (Cr, C)  fc1 weight (PyTorch (Cr, C, 1, 1) squeezed)
      [0:Cr,    C   ] = b1       (Cr,)    fc1 bias (stored as a column)
      [r0:r0+C, 0:Cr] = w2       (C, Cr)  fc2 weight
      [r0:r0+C, Cr  ] = b2       (C,)     fc2 bias
      [r0:r0+C, Cr+1] = se_bias  (C,)     gate bias, raw (tanh/relu done in-kernel)
    """
    cr, c = w1.shape
    r0 = _row0(cr)
    p = jnp.zeros((r0 + c, c + 1), jnp.float32)
    p = p.at[0:cr, 0:c].set(w1.astype(jnp.float32))
    p = p.at[0:cr, c].set(b1.astype(jnp.float32))
    p = p.at[r0:r0 + c, 0:cr].set(w2.astype(jnp.float32))
    p = p.at[r0:r0 + c, cr].set(b2.astype(jnp.float32))
    p = p.at[r0:r0 + c, cr + 1].set(se_bias.astype(jnp.float32))
    return p


def _pick_block_n(n, c, hw, itemsize):
    """Samples per grid step: fat enough (~2 MiB of x) to amortize the ~0.35us/step
    pipeline overhead, small enough that double-buffered in+out stays well under the
    v7x 32 MiB scoped-VMEM default, and leaving >= 2 grid steps for the two v7x TCs."""
    per_sample = max(1, c * hw * itemsize)
    b = max(1, min(n, (2 << 20) // per_sample))
    if n >= 2:
        b = min(b, -(-n // 2))          # keep grid length >= 2
    return b


def _se_kernel(x_ref, p_ref, o_ref, *, W, Cr, R0, N, B_blk):
    # x_ref block: (B_blk, C, HW) with HW = H*W on the 128-lane axis (lane-dense).
    _, C, HW = x_ref.shape

    # ---- hoisted, grid-step-invariant parameter prep (one packed, resident DMA) ----
    w1 = p_ref[0:Cr, 0:C]                       # (Cr, C)
    b1 = p_ref[0:Cr, C:C + 1]                   # (Cr, 1)
    w2 = p_ref[R0:R0 + C, 0:Cr]                 # (C, Cr)
    b2 = p_ref[R0:R0 + C, Cr:Cr + 1]            # (C, 1)
    # relu(pooled*tanh(bias))/2 with pooled >= 0 folds to pooled * relu(0.5*tanh(bias));
    # tanh/relu on (C,1) ride otherwise-idle EUP/VPU slots (no full-size (C,HW) relu).
    g = jnp.maximum(0.5 * jnp.tanh(p_ref[R0:R0 + C, Cr + 1:Cr + 2]), 0.0)   # (C, 1)

    # ---- hoisted boundary masks for the separable 5x5 min-pool ----
    # (1, HW) iota broadcasts over sublanes; no full (C, HW) int32 arrays kept live.
    pinf = jnp.float32(jnp.inf)
    lane = lax.broadcasted_iota(jnp.int32, (1, HW), 1)
    w_idx = (lane & (W - 1)) if (W & (W - 1)) == 0 else (lane % W)
    # (valid_mask, lane_shift) pairs; +inf at invalid taps == MaxPool2d's -inf padding
    # after the surrounding negation.  pltpu.roll: out[i] = in[(i - shift) % n].
    taps_w, taps_h = [], []
    for d in (1, 2):
        taps_w.append((w_idx < W - d, HW - d))            # neighbor at w + d
        taps_w.append((w_idx >= d, d))                    # neighbor at w - d
        taps_h.append((lane < HW - d * W, HW - d * W))    # neighbor at h + d
        taps_h.append((lane >= d * W, d * W))             # neighbor at h - d

    def one_sample(b):
        x = x_ref[b]                                                  # (C, HW)
        # 1x1 convs == channel matmuls; MXU free dim = HW (lane-native).
        a = jnp.dot(w1, x, preferred_element_type=jnp.float32) + b1   # (Cr, HW)
        a = jnp.maximum(a, 0.0)
        a = jnp.dot(w2, a, preferred_element_type=jnp.float32) + b2   # (C, HW)
        a = jax.nn.sigmoid(a)

        # maxpool5x5(-a, stride 1, pad 2) * -1 == separable 5-tap min along W then H
        # (XLU lane rotations; no concatenate temporaries, no sublane-offset slices).
        mw = a
        for mask, shift in taps_w:
            mw = jnp.minimum(mw, jnp.where(mask, pltpu.roll(a, shift, axis=1), pinf))
        pooled = mw
        for mask, shift in taps_h:
            pooled = jnp.minimum(pooled, jnp.where(mask, pltpu.roll(mw, shift, axis=1), pinf))

        # Gate and output; re-read x from VMEM at the store so it is not live across
        # the whole pooling sequence (spill insurance at larger B_blk).
        o_ref[b] = (x_ref[b] * (pooled * g)).astype(o_ref.dtype)

    if N % B_blk == 0:
        def body(b, carry):
            one_sample(b)
            return carry
        lax.fori_loop(0, B_blk, body, 0, unroll=B_blk <= 4)
    else:
        # Ragged tail: only the first (N - step*B_blk) samples of the last block are
        # real; skip the rest (their out-of-bounds block rows are never written).
        base = pl.program_id(0) * B_blk

        def guarded(b, carry):
            @pl.when(base + b < N)
            def _():
                one_sample(b)
            return carry
        lax.fori_loop(0, B_blk, guarded, 0, unroll=B_blk <= 4)


@functools.partial(jax.jit, static_argnames=("cr", "block_n"))
def se_module_v2_packed(x_nchw, params, *, cr, block_n=None):
    """x_nchw: (N,C,H,W) f32.  params: pack_se_params(...).  cr = C // r (static)."""
    N, C, H, W = x_nchw.shape
    HW = H * W
    r0 = _row0(cr)
    B_blk = block_n if block_n is not None else _pick_block_n(
        N, C, HW, jnp.dtype(x_nchw.dtype).itemsize)

    # Free, contiguous reshape (no HBM transpose pass): spatial goes to the lane axis.
    xf = x_nchw.reshape(N, C, HW)

    out = pl.pallas_call(
        functools.partial(_se_kernel, W=W, Cr=cr, R0=r0, N=N, B_blk=B_blk),
        out_shape=jax.ShapeDtypeStruct((N, C, HW), x_nchw.dtype),
        grid_spec=pltpu.PrefetchScalarGridSpec(
            num_scalar_prefetch=0,
            grid=(pl.cdiv(N, B_blk),),
            in_specs=[
                pl.BlockSpec((B_blk, C, HW), lambda n: (n, 0, 0)),
                # Same block index every step -> fetched once, stays VMEM-resident.
                pl.BlockSpec((r0 + C, C + 1), lambda n: (0, 0)),
            ],
            out_specs=pl.BlockSpec((B_blk, C, HW), lambda n: (n, 0, 0)),
        ),
        compiler_params=pltpu.CompilerParams(
            dimension_semantics=("parallel",)),   # independent steps -> both v7x TCs busy
    )(xf, params)

    return out.reshape(N, C, H, W)


def se_module_v2(x_nchw, w1, b1, w2, b2, se_bias):
    """Convenience wrapper matching the PyTorch module's raw parameters.
    In a real model, call pack_se_params once and reuse se_module_v2_packed."""
    return se_module_v2_packed(x_nchw, pack_se_params(w1, b1, w2, b2, se_bias),
                               cr=w1.shape[0])


def _reference(x, w1, b1, w2, b2, se_bias):
    """Pure-JAX reference in NCHW, mirroring the PyTorch forward exactly."""
    a = jnp.einsum('dc,nchw->ndhw', w1, x) + b1[None, :, None, None]
    a = jnp.maximum(a, 0.0)
    a = jnp.einsum('cd,ndhw->nchw', w2, a) + b2[None, :, None, None]
    a = jax.nn.sigmoid(a)
    pooled = lax.reduce_window(
        -a, -jnp.inf, lax.max,
        window_dimensions=(1, 1, 5, 5), window_strides=(1, 1, 1, 1),
        padding=((0, 0), (0, 0), (2, 2), (2, 2))) * -1.0
    gate = jnp.maximum(pooled * jnp.tanh(se_bias)[None, :, None, None], 0.0) / 2.0
    return x * gate


if __name__ == "__main__":
    C, H, W = 32, 16, 16
    r = 16
    Cr = C // r                                   # = 2

    key = jax.random.PRNGKey(0)
    k_x, k_x2, k_w1, k_b1, k_w2, k_b2, k_sb = jax.random.split(key, 7)

    # fc1: Conv2d(C, Cr, 1) -> weight (Cr, C, 1, 1) flattened to (Cr, C)
    w1 = 0.2 * jax.random.normal(k_w1, (Cr, C), jnp.float32)
    b1 = 0.1 * jax.random.normal(k_b1, (Cr,), jnp.float32)
    # fc2: Conv2d(Cr, C, 1) -> weight (C, Cr, 1, 1) flattened to (C, Cr)
    w2 = 0.2 * jax.random.normal(k_w2, (C, Cr), jnp.float32)
    b2 = 0.1 * jax.random.normal(k_b2, (C,), jnp.float32)
    # Module __init__ zeroes the gate bias (output would be trivially 0);
    # use deterministic nonzero values so the kernel path is actually exercised.
    se_bias = 0.5 * jax.random.normal(k_sb, (C,), jnp.float32)

    params = pack_se_params(w1, b1, w2, b2, se_bias)   # pack once, reuse per call

    # Case 1: small batch, auto block size (B_blk=1 -> grid=(2,), both v7x TCs).
    x = jax.random.normal(k_x, (2, C, H, W), jnp.float32)
    out = jax.block_until_ready(se_module_v2_packed(x, params, cr=Cr))
    np.testing.assert_allclose(np.asarray(out),
                               np.asarray(_reference(x, w1, b1, w2, b2, se_bias)),
                               rtol=1e-4, atol=1e-5)

    # Case 2: batched blocks with a ragged tail (N=3, block_n=2 -> grid=(2,),
    # last step has 1 real sample, guarded with pl.when).
    x2 = jax.random.normal(k_x2, (3, C, H, W), jnp.float32)
    out2 = jax.block_until_ready(se_module_v2_packed(x2, params, cr=Cr, block_n=2))
    np.testing.assert_allclose(np.asarray(out2),
                               np.asarray(_reference(x2, w1, b1, w2, b2, se_bias)),
                               rtol=1e-4, atol=1e-5)

    print("KERNEL_OK")
</pallas_src>

<mosaic_0001>
module attributes {stable_mosaic.version = 11 : i64} {
  func.func @_se_kernel(%arg0: i32, %arg1: memref<1x32x256xf32, #tpu.memory_space<vmem>>, %arg2: memref<40x33xf32, #tpu.memory_space<vmem>>, %arg3: memref<1x32x256xf32, #tpu.memory_space<vmem>>) attributes {dimension_semantics = [#tpu.dimension_semantics<parallel>], iteration_bounds = array<i64: 2>, scalar_prefetch = 0 : i64, scratch_operands = 0 : i64, tpu.core_type = #tpu.core_type<tc>, window_params = [{transform_indices = @transform_0, window_bounds = array<i64: 1, 32, 256>}, {pipeline_mode = #tpu.pipeline_mode<synchronous>, transform_indices = @transform_1, window_bounds = array<i64: 40, 33>}, {transform_indices = @transform_2, window_bounds = array<i64: 1, 32, 256>}]} {
    %c0 = arith.constant 0 : index
    %c0_0 = arith.constant 0 : index
    %0 = vector.load %arg2[%c0, %c0_0] : memref<40x33xf32, #tpu.memory_space<vmem>>, vector<2x32xf32>
    %c0_1 = arith.constant 0 : index
    %c32 = arith.constant 32 : index
    %1 = vector.load %arg2[%c0_1, %c32] : memref<40x33xf32, #tpu.memory_space<vmem>>, vector<2x1xf32>
    %c8 = arith.constant 8 : index
    %c0_2 = arith.constant 0 : index
    %2 = vector.load %arg2[%c8, %c0_2] : memref<40x33xf32, #tpu.memory_space<vmem>>, vector<32x2xf32>
    %c8_3 = arith.constant 8 : index
    %c2 = arith.constant 2 : index
    %3 = vector.load %arg2[%c8_3, %c2] : memref<40x33xf32, #tpu.memory_space<vmem>>, vector<32x1xf32>
    %c8_4 = arith.constant 8 : index
    %c3 = arith.constant 3 : index
    %4 = vector.load %arg2[%c8_4, %c3] : memref<40x33xf32, #tpu.memory_space<vmem>>, vector<32x1xf32>
    %5 = math.tanh %4 : vector<32x1xf32>
    %cst = arith.constant 5.000000e-01 : f32
    %6 = vector.broadcast %cst : f32 to vector<32x1xf32>
    %7 = arith.mulf %6, %5 : vector<32x1xf32>
    %cst_5 = arith.constant 0.000000e+00 : f32
    %8 = vector.broadcast %cst_5 : f32 to vector<32x1xf32>
    %9 = arith.maximumf %7, %8 : vector<32x1xf32>
    %10 = tpu.iota {dimensions = array<i32: 1>} : vector<1x256xi32>
    %c15_i32 = arith.constant 15 : i32
    %11 = vector.broadcast %c15_i32 : i32 to vector<1x256xi32>
    %12 = arith.andi %10, %11 : vector<1x256xi32>
    %c15_i32_6 = arith.constant 15 : i32
    %13 = vector.broadcast %c15_i32_6 : i32 to vector<1x256xi32>
    %14 = arith.cmpi slt, %12, %13 : vector<1x256xi32>
    %c1_i32 = arith.constant 1 : i32
    %15 = vector.broadcast %c1_i32 : i32 to vector<1x256xi32>
    %16 = arith.cmpi sge, %12, %15 : vector<1x256xi32>
    %c240_i32 = arith.constant 240 : i32
    %17 = vector.broadcast %c240_i32 : i32 to vector<1x256xi32>
    %18 = arith.cmpi slt, %10, %17 : vector<1x256xi32>
    %c16_i32 = arith.constant 16 : i32
    %19 = vector.broadcast %c16_i32 : i32 to vector<1x256xi32>
    %20 = arith.cmpi sge, %10, %19 : vector<1x256xi32>
    %c14_i32 = arith.constant 14 : i32
    %21 = vector.broadcast %c14_i32 : i32 to vector<1x256xi32>
    %22 = arith.cmpi slt, %12, %21 : vector<1x256xi32>
    %c2_i32 = arith.constant 2 : i32
    %23 = vector.broadcast %c2_i32 : i32 to vector<1x256xi32>
    %24 = arith.cmpi sge, %12, %23 : vector<1x256xi32>
    %c224_i32 = arith.constant 224 : i32
    %25 = vector.broadcast %c224_i32 : i32 to vector<1x256xi32>
    %26 = arith.cmpi slt, %10, %25 : vector<1x256xi32>
    %c32_i32 = arith.constant 32 : i32
    %27 = vector.broadcast %c32_i32 : i32 to vector<1x256xi32>
    %28 = arith.cmpi sge, %10, %27 : vector<1x256xi32>
    %cst_7 = arith.constant 0x7F800000 : f32
    %c0_i32 = arith.constant 0 : i32
    %29 = arith.index_cast %c0_i32 : i32 to index
    %c0_8 = arith.constant 0 : index
    %c0_9 = arith.constant 0 : index
    %30 = vector.load %arg1[%29, %c0_8, %c0_9] : memref<1x32x256xf32, #tpu.memory_space<vmem>>, vector<1x32x256xf32>
    %31 = vector.shape_cast %30 : vector<1x32x256xf32> to vector<32x256xf32>
    %cst_10 = arith.constant dense<0.000000e+00> : vector<2x256xf32>
    %32 = tpu.matmul %0, %31, %cst_10 {dimension_numbers = #tpu.dot_dimension_numbers<[1], [0], [0], [1], [0, 0, 1, 1], [], []>} : vector<2x32xf32>, vector<32x256xf32>, vector<2x256xf32> -> vector<2x256xf32>
    %33 = vector.broadcast %1 : vector<2x1xf32> to vector<2x256xf32>
    %34 = arith.addf %32, %33 : vector<2x256xf32>
    %cst_11 = arith.constant 0.000000e+00 : f32
    %35 = vector.broadcast %cst_11 : f32 to vector<2x256xf32>
    %36 = arith.maximumf %34, %35 : vector<2x256xf32>
    %cst_12 = arith.constant dense<0.000000e+00> : vector<32x256xf32>
    %37 = tpu.matmul %2, %36, %cst_12 {dimension_numbers = #tpu.dot_dimension_numbers<[1], [0], [0], [1], [0, 0, 1, 1], [], []>} : vector<32x2xf32>, vector<2x256xf32>, vector<32x256xf32> -> vector<32x256xf32>
    %38 = vector.broadcast %3 : vector<32x1xf32> to vector<32x256xf32>
    %39 = arith.addf %37, %38 : vector<32x256xf32>
    %40 = arith.negf %39 : vector<32x256xf32>
    %41 = math.exp %40 : vector<32x256xf32>
    %cst_13 = arith.constant 1.000000e+00 : f32
    %42 = vector.broadcast %cst_13 : f32 to vector<32x256xf32>
    %43 = arith.addf %42, %41 : vector<32x256xf32>
    %44 = arith.divf %42, %43 : vector<32x256xf32>
    %c255_i32 = arith.constant 255 : i32
    %45 = tpu.dynamic_rotate %44 by %c255_i32 dim 1 : vector<32x256xf32>, i32 -> vector<32x256xf32>
    %46 = vector.shape_cast %14 : vector<1x256xi1> to vector<1x256xi1>
    %47 = vector.broadcast %46 : vector<1x256xi1> to vector<32x256xi1>
    %48 = vector.broadcast %cst_7 : f32 to vector<32x256xf32>
    %49 = arith.select %47, %45, %48 : vector<32x256xi1>, vector<32x256xf32>
    %50 = arith.minimumf %44, %49 : vector<32x256xf32>
    %c1_i32_14 = arith.constant 1 : i32
    %51 = tpu.dynamic_rotate %44 by %c1_i32_14 dim 1 : vector<32x256xf32>, i32 -> vector<32x256xf32>
    %52 = vector.shape_cast %16 : vector<1x256xi1> to vector<1x256xi1>
    %53 = vector.broadcast %52 : vector<1x256xi1> to vector<32x256xi1>
    %54 = vector.broadcast %cst_7 : f32 to vector<32x256xf32>
    %55 = arith.select %53, %51, %54 : vector<32x256xi1>, vector<32x256xf32>
    %56 = arith.minimumf %50, %55 : vector<32x256xf32>
    %c254_i32 = arith.constant 254 : i32
    %57 = tpu.dynamic_rotate %44 by %c254_i32 dim 1 : vector<32x256xf32>, i32 -> vector<32x256xf32>
    %58 = vector.shape_cast %22 : vector<1x256xi1> to vector<1x256xi1>
    %59 = vector.broadcast %58 : vector<1x256xi1> to vector<32x256xi1>
    %60 = vector.broadcast %cst_7 : f32 to vector<32x256xf32>
    %61 = arith.select %59, %57, %60 : vector<32x256xi1>, vector<32x256xf32>
    %62 = arith.minimumf %56, %61 : vector<32x256xf32>
    %c2_i32_15 = arith.constant 2 : i32
    %63 = tpu.dynamic_rotate %44 by %c2_i32_15 dim 1 : vector<32x256xf32>, i32 -> vector<32x256xf32>
    %64 = vector.shape_cast %24 : vector<1x256xi1> to vector<1x256xi1>
    %65 = vector.broadcast %64 : vector<1x256xi1> to vector<32x256xi1>
    %66 = vector.broadcast %cst_7 : f32 to vector<32x256xf32>
    %67 = arith.select %65, %63, %66 : vector<32x256xi1>, vector<32x256xf32>
    %68 = arith.minimumf %62, %67 : vector<32x256xf32>
    %c240_i32_16 = arith.constant 240 : i32
    %69 = tpu.dynamic_rotate %68 by %c240_i32_16 dim 1 : vector<32x256xf32>, i32 -> vector<32x256xf32>
    %70 = vector.shape_cast %18 : vector<1x256xi1> to vector<1x256xi1>
    %71 = vector.broadcast %70 : vector<1x256xi1> to vector<32x256xi1>
    %72 = vector.broadcast %cst_7 : f32 to vector<32x256xf32>
    %73 = arith.select %71, %69, %72 : vector<32x256xi1>, vector<32x256xf32>
    %74 = arith.minimumf %68, %73 : vector<32x256xf32>
    %c16_i32_17 = arith.constant 16 : i32
    %75 = tpu.dynamic_rotate %68 by %c16_i32_17 dim 1 : vector<32x256xf32>, i32 -> vector<32x256xf32>
    %76 = vector.shape_cast %20 : vector<1x256xi1> to vector<1x256xi1>
    %77 = vector.broadcast %76 : vector<1x256xi1> to vector<32x256xi1>
    %78 = vector.broadcast %cst_7 : f32 to vector<32x256xf32>
    %79 = arith.select %77, %75, %78 : vector<32x256xi1>, vector<32x256xf32>
    %80 = arith.minimumf %74, %79 : vector<32x256xf32>
    %c224_i32_18 = arith.constant 224 : i32
    %81 = tpu.dynamic_rotate %68 by %c224_i32_18 dim 1 : vector<32x256xf32>, i32 -> vector<32x256xf32>
    %82 = vector.shape_cast %26 : vector<1x256xi1> to vector<1x256xi1>
    %83 = vector.broadcast %82 : vector<1x256xi1> to vector<32x256xi1>
    %84 = vector.broadcast %cst_7 : f32 to vector<32x256xf32>
    %85 = arith.select %83, %81, %84 : vector<32x256xi1>, vector<32x256xf32>
    %86 = arith.minimumf %80, %85 : vector<32x256xf32>
    %c32_i32_19 = arith.constant 32 : i32
    %87 = tpu.dynamic_rotate %68 by %c32_i32_19 dim 1 : vector<32x256xf32>, i32 -> vector<32x256xf32>
    %88 = vector.shape_cast %28 : vector<1x256xi1> to vector<1x256xi1>
    %89 = vector.broadcast %88 : vector<1x256xi1> to vector<32x256xi1>
    %90 = vector.broadcast %cst_7 : f32 to vector<32x256xf32>
    %91 = arith.select %89, %87, %90 : vector<32x256xi1>, vector<32x256xf32>
    %92 = arith.minimumf %86, %91 : vector<32x256xf32>
    %93 = arith.index_cast %c0_i32 : i32 to index
    %c0_20 = arith.constant 0 : index
    %c0_21 = arith.constant 0 : index
    %94 = vector.load %arg1[%93, %c0_20, %c0_21] : memref<1x32x256xf32, #tpu.memory_space<vmem>>, vector<1x32x256xf32>
    %95 = vector.shape_cast %94 : vector<1x32x256xf32> to vector<32x256xf32>
    %96 = vector.broadcast %9 : vector<32x1xf32> to vector<32x256xf32>
    %97 = arith.mulf %92, %96 : vector<32x256xf32>
    %98 = arith.mulf %95, %97 : vector<32x256xf32>
    %99 = arith.index_cast %c0_i32 : i32 to index
    %c0_22 = arith.constant 0 : index
    %c0_23 = arith.constant 0 : index
    %100 = vector.load %arg3[%99, %c0_22, %c0_23] : memref<1x32x256xf32, #tpu.memory_space<vmem>>, vector<1x32x256xf32>
    %101 = vector.shape_cast %100 : vector<1x32x256xf32> to vector<32x256xf32>
    %102 = vector.shape_cast %98 : vector<32x256xf32> to vector<1x32x256xf32>
    tpu.vector_store %arg3[%99, %c0_22, %c0_23], %102 {strides = array<i32>} : memref<1x32x256xf32, #tpu.memory_space<vmem>>, vector<1x32x256xf32>,
    %c1_i32_24 = arith.constant 1 : i32
    return
  }
  func.func @transform_0(%arg0: i32) -> (i32, i32, i32) {
    %c0_i32 = arith.constant 0 : i32
    %c0_i32_0 = arith.constant 0 : i32
    %c0_i32_1 = arith.constant 0 : i32
    return %arg0, %c0_i32, %c0_i32_0 : i32, i32, i32
  }
  func.func @transform_1(%arg0: i32) -> (i32, i32) {
    %c0_i32 = arith.constant 0 : i32
    %c0_i32_0 = arith.constant 0 : i32
    %c0_i32_1 = arith.constant 0 : i32
    return %c0_i32, %c0_i32_0 : i32, i32
  }
  func.func @transform_2(%arg0: i32) -> (i32, i32, i32) {
    %c0_i32 = arith.constant 0 : i32
    %c0_i32_0 = arith.constant 0 : i32
    %c0_i32_1 = arith.constant 0 : i32
    return %arg0, %c0_i32, %c0_i32_0 : i32, i32, i32
  }
}

</mosaic_0001>

<bundles_post_ra>
// kernel: se_module_v2_packed.1
= control target key start
LH: loop header
LB: loop body
LE: loop exit
PB: predicated region body
PF: predicated region fallthrough
CT: control target
= control target key end

     0   :  { %s1039_s9 = smov 0   ;;  %s1609_s0 = inlined_call_operand.vmem [shape: f32[2,32,256], index: 0, kind: input, shape index: {}]   ;;  %s1610_s1 = inlined_call_operand.vmem [shape: f32[40,33], index: 1, kind: input, shape index: {}]   ;;  %s1611_s2 = inlined_call_operand.vmem [shape: f32[2,32,256], index: 2, kind: output, shape index: {}]  }
   0x1 LB: > { %s903_s10 = sadd.s32 4294967295, %s1010_s9   ;;  %p907_p0 = scmp.ge.s32.totalorder %s1010_s9, 1  ;;  %s1010_s9 = sphi %s1039_s9, %s12_s9  }
   0x2   : > { %p112_p1 = scmp.lt.s32.totalorder %s1010_s9, 3 }
   0x4   : > { %p113_p2 = pnand %p907_p0, %p112_p1 }
   0x5   : > { %p134_p3 = scmp.lt.s32.totalorder (!%p113_p2), %s903_s10, 1  ;;  %v1012_v0 = vmov (!%p113_p2), 0.0   ;;  %v144_v1 = vld [vmem:[%s1610_s1] sm:$0x3] (!%p113_p2)  ;;  %v1013_v2 = vmov (!%p113_p2), 32   ;;  %vm195_vm0 = vcmask (!%p113_p2), 261120  }
   0x6   : > { %116 = sbr.rel (%p113_p2) target bundleno = 818 (0x332), region = 28  ;;  %262 = vmatprep.mubr.f32.mxu0 (!%p113_p2), %v1012_v0  ;;  %959 = vset.pattern.permute.xlu0 (!%p113_p2), %v1013_v2  ;;  %v145_v15 = vld [vmem:[%s1610_s1 + $0x8] sm:$0xff] (!%p113_p2)  ;;  %v146_v16 = vld [vmem:[%s1610_s1 + $0x10] sm:$0xff] (!%p113_p2)  ;;  %v1014_v17 = vmov (!%p113_p2), 2   ;;  %v1091_v18 = vld [vmem:[%s1610_s1 + $0x18] sm:$0xff] (!%p113_p2)  ;;  %vm300_vm1 = vcmask (!%p113_p2), 1041408  }
   0x7   : > { %192 = vperm.xlu0 (!%p113_p2), %959, %v144_v1   ;;  %371 = vmatprep.mubr.f32.mxu1 (!%p113_p2), %v1012_v0  ;;  %v1097_v19 = vld [vmem:[%s1610_s1 + $0x20] sm:$0xff] (!%p113_p2)  ;;  %vm291_vm2 = vcmask (!%p113_p2), 15360   ;;  %964 = vtanh.f32 (!%p113_p2), %v145_v15  ;;  %v1015_v31 = vmov (!%p113_p2), 3   ;;  %s1016_s25 = smov (!%p113_p2), 127   ;;  %s1017_s26 = smov (!%p113_p2), 1  }
   0x8   : > { %961 = vset.pattern.permute.xlu1 (!%p113_p2), %v1014_v17  ;;  %966 = vtanh.f32 (!%p113_p2), %v146_v16  ;;  %s1018_s27 = smov (!%p113_p2), 126   ;;  %s1019_s28 = smov (!%p113_p2), 2  }
   0x9   : > { %278 = vperm.xlu1 (!%p113_p2), %961, %v146_v16   ;;  %s1020_s29 = smov (!%p113_p2), 96   ;;  %s1021_s30 = smov (!%p113_p2), 112  }
   0xa   : > { %s1022_s3 = smov (!%p113_p2), 32   ;;  %s1023_s4 = smov (!%p113_p2), 16  }
   0xb   : > { %960 = vset.pattern.permute.xlu0 (!%p113_p2), %v1014_v17 }
   0xc   : > { %273 = vperm.xlu0 (!%p113_p2), %960, %v145_v15  }
   0xd   : > { %s1613_s10 = smov (!%p134_p3, %s903_s10), 1  ;;  %283 = vperm.xlu1 %961, %v1091_v18  }
   0xe   : > { %s929_s13 = sshll.u32 %s1613_s10, 6 }
   0xf   : > { %s138_s16 = scalar_lea.vmem %s1609_s0, %s929_s13  ;;  %s1503_s7 = scalar_lea.vmem %s1611_s2, %s929_s13 }
  0x10   : > { %v1058_v3 = vld [vmem:[%s138_s16 + $0x8] sm:$0xff]  ;;  %v1060_v4 = vld [vmem:[%s138_s16 + $0x18] sm:$0xff]  ;;  %v1062_v5 = vld [vmem:[%s138_s16] sm:$0xff]  ;;  %962 = vset.pattern.permute.xlu0 %v1015_v31 }
  0x11   : > { %v931_v6 = vpack.c.bf16 %v1060_v4, %v1058_v3  ;;  %v1066_v7 = vld [vmem:[%s138_s16 + $0x10] sm:$0xff]  ;;  %v1068_v8 = vld [vmem:[%s138_s16 + $0x28] sm:$0xff]  ;;  %v1070_v9 = vld [vmem:[%s138_s16 + $0x38] sm:$0xff]  ;;  %288 = vperm.xlu1 %961, %v1097_v19   ;;  %v965_v27 = vpop.eup %964 }
  0x12   : > { %v933_v10 = vpack.c.bf16 %v1066_v7, %v1062_v5  ;;  %v935_v11 = vpack.c.bf16 %v1070_v9, %v1068_v8  ;;  %v1076_v12 = vld [vmem:[%s138_s16 + $0x20] sm:$0xff]  ;;  %v1078_v13 = vld [vmem:[%s138_s16 + $0x30] sm:$0xff]  ;;  %v153_v28 = vmul.f32 0.5, %v965_v27  ;;  %v967_v30 = vpop.eup %966 }
  0x13   : > { %932 = vmatprep.subr.bf16.mxu0 %v931_v6  ;;  %v937_v14 = vpack.c.bf16 %v1078_v13, %v1076_v12  ;;  %v154_v32 = vmul.f32 0.5, %v967_v30 }
  0x14   : > { %934 = vmatpush1.bf16.msra.mxu0 %v933_v10  ;;  %v157_v29 = vmax.f32 %v153_v28, 0.0 }
  0x15   : > { %936 = vmatprep.subr.bf16.mxu0 %v935_v11  ;;  %963 = vset.pattern.permute.xlu1 %v1015_v31  ;;  %v158_v33 = vmax.f32 %v154_v32, 0.0 }
  0x16   : > { %806 = vperm.xlu0 %962, %v157_v29  }
  0x17   : > { %811 = vperm.xlu1 %963, %v158_v33  }
  0x18   : > { %938 = vmatpush1.bf16.msra.mxu0 %v937_v14 }
  0x1b   : > { %912 = vmatmul.mubr.msk.f32.vlgmr.msra.gmra.mrb[0].mxu0 %vm195_vm0, %v144_v1 }
  0x86   : > { %v193_v20 = vpop.permute.xlu0 %192 }
  0x88   : > { %v279_v38 = vpop.permute.xlu1 %278 }
  0x8b   : > { %v274_v34 = vpop.permute.xlu0 %273 }
  0x8c   : > { %v284_v56 = vpop.permute.xlu1 %283 }
  0x90   : > { %v289_v58 = vpop.permute.xlu1 %288 }
  0xee   : > { %v264_v21 = vpop.f32.mrb[0].mxu0 }
  0xef   : > { %v265_v22 = vadd.f32 %v264_v21, %v193_v20  ;;  %v266_v23 = vpop.f32.mrb[1].mxu0 }
  0xf0   : > { %v267_v24 = vadd.f32 %v266_v23, %v193_v20 }
  0xf1   : > { %v269_v26 = vmax.f32 %v265_v22, 0.0 }
  0xf2   : > { %v270_v25 = vmax.f32 %v267_v24, 0.0 }
  0xf4   : > { %913 = vmatprep.subr.msk.mxu1 %vm300_vm1, %v270_v25 }
  0xf5   : > { %914 = vmatpush1.msk.msra.mxu1 %vm300_vm1, %v269_v26 }
  0xf6   : > { %915 = vmatmul.mubr.msk.f32.vlgmr.msra.gmra.mrb[0].mxu1 %vm291_vm2, %v145_v15 }
  0xf7   : > { %377 = vmatprep.mubr.f32.mxu1 %v1012_v0 }
  0xfa   : > { %916 = vmatmul.mubr.msk.f32.gmra.mrb[2].mxu1 %vm291_vm2, %v146_v16 }
  0xfb   : > { %383 = vmatprep.mubr.f32.mxu1 %v1012_v0 }
  0xfe   : > { %917 = vmatmul.mubr.msk.f32.gmra.mrb[4].mxu1 %vm291_vm2, %v1091_v18 }
  0xff   : > { %389 = vmatprep.mubr.f32.mxu1 %v1012_v0 }
 0x102   : > { %918 = vmatmul.mubr.msk.f32.gmra.mrb[6].mxu1 %vm291_vm2, %v1097_v19 }
 0x1c9   : > { %v373_v35 = vpop.f32.mrb[0].mxu1 }
 0x1ca   : > { %v374_v36 = vadd.f32 %v373_v35, %v274_v34  ;;  %v375_v37 = vpop.f32.mrb[1].mxu1 }
 0x1cb   : > { %v376_v45 = vadd.f32 %v375_v37, %v274_v34  ;;  %v1186_v37 = vpop.permute.xlu1 %811 }
 0x1cc   : > { %v919_v39 = vmul.f32 -1.442695, %v374_v36  ;;  %v1184_v36 = vpop.permute.xlu0 %806 }
 0x1cd   : > { %v379_v40 = vpop.f32.mrb[2].mxu1  ;;  %v920_v48 = vmul.f32 -1.442695, %v376_v45 }
 0x1ce   : > { %968 = vpow2.f32 %v919_v39  ;;  %v380_v41 = vadd.f32 %v379_v40, %v279_v38  ;;  %v381_v42 = vpop.f32.mrb[3].mxu1 }
 0x1cf   : > { %v382_v49 = vadd.f32 %v381_v42, %v279_v38 }
 0x1d0   : > { %v921_v43 = vmul.f32 -1.442695, %v380_v41  ;;  %v161_v41 = vlaneseq }
 0x1d1   : > { %v385_v44 = vpop.f32.mrb[4].mxu1  ;;  %v922_v53 = vmul.f32 -1.442695, %v382_v49 }
 0x1d2   : > { %970 = vpow2.f32 %v921_v43  ;;  %v387_v46 = vpop.f32.mrb[5].mxu1  ;;  %v386_v57 = vadd.f32 %v385_v44, %v284_v56  ;;  %v1192_v44 = vand.u32 127, %v161_v41 }
 0x1d3   : > { %972 = vpow2.f32 %v920_v48  ;;  %v388_v10 = vadd.f32 %v387_v46, %v284_v56 }
 0x1d4   : > { %v923_v61 = vmul.f32 -1.442695, %v386_v57  ;;  %v1200_v48 = vand.u32 15, %v1192_v44  ;;  %vm460_vm3 = vcmp.lt.s32.totalorder %v1192_v44, 127  ;;  %vm505_vm4 = vcmp.lt.s32.totalorder %v1192_v44, 1 }
 0x1d5   : > { %v391_v47 = vpop.f32.mrb[6].mxu1  ;;  %v924_v15 = vmul.f32 -1.442695, %v388_v10  ;;  %vm550_vm7 = vcmp.lt.s32.totalorder %v1192_v44, 126  ;;  %vm595_vm11 = vcmp.lt.s32.totalorder %v1192_v44, 2  ;;  %vm640_vm15 = vcmp.lt.s32.totalorder %v1192_v44, 112 }
 0x1d6   : > { %v393_v50 = vpop.f32.mrb[7].mxu1  ;;  %v392_v62 = vadd.f32 %v391_v47, %v289_v58  ;;  %v1197_v47 = vadd.s32 128, %v1192_v44  ;;  %vm166_vm5 = vcmp.lt.s32.totalorder %v1200_v48, 15  ;;  %vm168_vm6 = vcmp.ge.s32.totalorder %v1200_v48, 1 }
 0x1d7   : > { %v394_v16 = vadd.f32 %v393_v50, %v289_v58  ;;  %vm174_vm9 = vcmp.lt.s32.totalorder %v1200_v48, 14  ;;  %vm176_vm13 = vcmp.ge.s32.totalorder %v1200_v48, 2  ;;  %vm730_vm1 = vcmp.lt.s32.totalorder %v1192_v44, 96 }
 0x1d8   : > { %v969_v51 = vpop.eup %968  ;;  %v925_v2 = vmul.f32 -1.442695, %v392_v62  ;;  %vm171_vm0 = vcmp.lt.s32.totalorder %v1197_v47, 240  ;;  %vm685_vm2 = vcmp.lt.s32.totalorder %v1192_v44, 16 }
 0x1d9   : > { %v420_v52 = vadd.f32 1.0, %v969_v51  ;;  %v926_v22 = vmul.f32 -1.442695, %v394_v16  ;;  %v1207_v51 = vand.u32 15, %v1197_v47 }
 0x1db   : > { %974 = vrcp.f32 %v420_v52  ;;  %vm167_vm8 = vcmp.lt.s32.totalorder %v1207_v51, 15  ;;  %vm169_vm10 = vcmp.ge.s32.totalorder %v1207_v51, 1  ;;  %vm175_vm12 = vcmp.lt.s32.totalorder %v1207_v51, 14 }
 0x1dc   : > { %v971_v54 = vpop.eup %970  ;;  %976 = vpow2.f32 %v922_v53  ;;  %vm177_vm14 = vcmp.ge.s32.totalorder %v1207_v51, 2 }
 0x1dd   : > { %v422_v55 = vadd.f32 1.0, %v971_v54  ;;  %v973_v59 = vpop.eup %972 }
 0x1de   : > { %v421_v63 = vadd.f32 1.0, %v973_v59 }
 0x1df   : > { %978 = vrcp.f32 %v422_v55 }
 0x1e0   : > { %980 = vpow2.f32 %v923_v61 }
 0x1e1   : > { %982 = vrcp.f32 %v421_v63 }
 0x1e2   : > { %984 = vpow2.f32 %v925_v2 }
 0x1e5   : > { %v1102_v60 = vpop.eup %974 }
 0x1e6   : > { %444 = vrot.lane.b32.xlu0 %v1102_v60, %s1016_s25  ;;  %v977_v0 = vpop.eup %976 }
 0x1e7   : > { %v423_v6 = vadd.f32 1.0, %v977_v0 }
 0x1e9   : > { %v1106_v1 = vpop.eup %978  ;;  %986 = vrcp.f32 %v423_v6 }
 0x1ea   : > { %446 = vrot.lane.b32.xlu1 %v1106_v1, %s1016_s25  ;;  %489 = vrot.lane.b32.xlu0 %v1102_v60, %s1017_s26  ;;  %v981_v11 = vpop.eup %980  ;;  %988 = vpow2.f32 %v924_v15 }
 0x1eb   : > { %v1120_v14 = vpop.eup %982  ;;  %v424_v17 = vadd.f32 1.0, %v981_v11 }
 0x1ec   : > { %v985_v20 = vpop.eup %984 }
 0x1ed   : > { %990 = vrcp.f32 %v424_v17  ;;  %v426_v23 = vadd.f32 1.0, %v985_v20 }
 0x1ee   : > { %491 = vrot.lane.b32.xlu1 %v1106_v1, %s1017_s26  ;;  %534 = vrot.lane.b32.xlu0 %v1102_v60, %s1018_s27  ;;  %992 = vpow2.f32 %v926_v22 }
 0x1ef   : > { %994 = vrcp.f32 %v426_v23 }
 0x1f2   : > { %536 = vrot.lane.b32.xlu1 %v1106_v1, %s1018_s27  ;;  %579 = vrot.lane.b32.xlu0 %v1102_v60, %s1019_s28 }
 0x1f3   : > { %v1126_v21 = vpop.eup %986 }
 0x1f4   : > { %v989_v24 = vpop.eup %988 }
 0x1f5   : > { %v425_v26 = vadd.f32 1.0, %v989_v24 }
 0x1f6   : > { %581 = vrot.lane.b32.xlu1 %v1106_v1, %s1019_s28  ;;  %452 = vrot.lane.b32.xlu0 %v1120_v14, %s1016_s25 }
 0x1f7   : > { %v1140_v25 = vpop.eup %990  ;;  %996 = vrcp.f32 %v425_v26 }
 0x1f8   : > { %v993_v27 = vpop.eup %992 }
 0x1f9   : > { %v1146_v28 = vpop.eup %994  ;;  %v427_v29 = vadd.f32 1.0, %v993_v27 }
 0x1fa   : > { %454 = vrot.lane.b32.xlu1 %v1126_v21, %s1016_s25  ;;  %497 = vrot.lane.b32.xlu0 %v1120_v14, %s1017_s26 }
 0x1fb   : > { %998 = vrcp.f32 %v427_v29 }
 0x1fc   : > { %1000 = vtanh.f32 %v1097_v19 }
 0x1fd   : > { %1002 = vtanh.f32 %v1091_v18 }
 0x1fe   : > { %499 = vrot.lane.b32.xlu1 %v1126_v21, %s1017_s26  ;;  %542 = vrot.lane.b32.xlu0 %v1120_v14, %s1018_s27 }
 0x201   : > { %v1161_v30 = vpop.eup %996 }
 0x202   : > { %544 = vrot.lane.b32.xlu1 %v1126_v21, %s1018_s27  ;;  %587 = vrot.lane.b32.xlu0 %v1120_v14, %s1019_s28 }
 0x205   : > { %v1168_v31 = vpop.eup %998 }
 0x206   : > { %589 = vrot.lane.b32.xlu1 %v1126_v21, %s1019_s28  ;;  %448 = vrot.lane.b32.xlu0 %v1140_v25, %s1016_s25  ;;  %v1001_v19 = vpop.eup %1000 }
 0x207   : > { %v156_v18 = vmul.f32 0.5, %v1001_v19  ;;  %v1003_v32 = vpop.eup %1002 }
 0x208   : > { %v155_v34 = vmul.f32 0.5, %v1003_v32 }
 0x209   : > { %v160_v33 = vmax.f32 %v156_v18, 0.0 }
 0x20a   : > { %450 = vrot.lane.b32.xlu1 %v1146_v28, %s1016_s25  ;;  %493 = vrot.lane.b32.xlu0 %v1140_v25, %s1017_s26  ;;  %v159_v35 = vmax.f32 %v155_v34, 0.0 }
 0x20e   : > { %495 = vrot.lane.b32.xlu1 %v1146_v28, %s1017_s26  ;;  %538 = vrot.lane.b32.xlu0 %v1140_v25, %s1018_s27 }
 0x212   : > { %540 = vrot.lane.b32.xlu1 %v1146_v28, %s1018_s27  ;;  %583 = vrot.lane.b32.xlu0 %v1140_v25, %s1019_s28 }
 0x216   : > { %585 = vrot.lane.b32.xlu1 %v1146_v28, %s1019_s28  ;;  %456 = vrot.lane.b32.xlu0 %v1161_v30, %s1016_s25 }
 0x21a   : > { %458 = vrot.lane.b32.xlu1 %v1168_v31, %s1016_s25  ;;  %501 = vrot.lane.b32.xlu0 %v1161_v30, %s1017_s26 }
 0x21e   : > { %503 = vrot.lane.b32.xlu1 %v1168_v31, %s1017_s26  ;;  %546 = vrot.lane.b32.xlu0 %v1161_v30, %s1018_s27 }
 0x222   : > { %548 = vrot.lane.b32.xlu1 %v1168_v31, %s1018_s27  ;;  %591 = vrot.lane.b32.xlu0 %v1161_v30, %s1019_s28 }
 0x226   : > { %593 = vrot.lane.b32.xlu1 %v1168_v31, %s1019_s28  ;;  %821 = vperm.xlu0 %962, %v160_v33  }
 0x22a   : > { %816 = vperm.xlu1 %963, %v159_v35  }
 0x258   : > { %v445_v38 = vpop.permute.xlu0 %444 }
 0x25c   : > { %v1188_v39 = vpop.permute.xlu1 %446  ;;  %v490_v40 = vpop.permute.xlu0 %489 }
 0x260   : > { %v1190_v42 = vpop.permute.xlu1 %491  ;;  %v535_v43 = vpop.permute.xlu0 %534 }
 0x264   : > { %v1194_v45 = vpop.permute.xlu1 %536  ;;  %v580_v46 = vpop.permute.xlu0 %579 }
 0x268   : > { %v1202_v49 = vpop.permute.xlu1 %581  ;;  %v453_v50 = vpop.permute.xlu0 %452 }
 0x269   : > { %v461_v52 = vsel %vm460_vm3, %v445_v38, %v453_v50  ;;  %v465_v57 = vsel %vm460_vm3, %v453_v50, %v445_v38 }
 0x26a   : > { %v473_v56 = vsel %vm166_vm5, %v461_v52, inf  ;;  %v474_v2 = vsel %vm167_vm8, %v465_v57, inf }
 0x26b   : > { %v481_v62 = vmin.f32 %v1102_v60, %v473_v56  ;;  %v482_v17 = vmin.f32 %v1120_v14, %v474_v2 }
 0x26c   : > { %v455_v53 = vpop.permute.xlu1 %454  ;;  %v498_v54 = vpop.permute.xlu0 %497 }
 0x26d   : > { %v510_v55 = vsel %vm505_vm4, %v498_v54, %v490_v40  ;;  %v506_v63 = vsel %vm505_vm4, %v490_v40, %v498_v54  ;;  %v462_v33 = vsel %vm460_vm3, %v1188_v39, %v455_v53 }
 0x26e   : > { %v518_v58 = vsel %vm168_vm6, %v510_v55, inf  ;;  %v519_v11 = vsel %vm169_vm10, %v506_v63, inf  ;;  %v475_v41 = vsel %vm166_vm5, %v462_v33, inf }
 0x26f   : > { %v526_v10 = vmin.f32 %v481_v62, %v518_v58  ;;  %v527_v27 = vmin.f32 %v482_v17, %v519_v11  ;;  %v483_v55 = vmin.f32 %v1106_v1, %v475_v41 }
 0x270   : > { %v500_v59 = vpop.permute.xlu1 %499  ;;  %v543_v61 = vpop.permute.xlu0 %542 }
 0x271   : > { %v551_v0 = vsel %vm550_vm7, %v535_v43, %v543_v61  ;;  %v555_v60 = vsel %vm550_vm7, %v543_v61, %v535_v43  ;;  %v511_v40 = vsel %vm505_vm4, %v500_v59, %v1190_v42  ;;  %v466_v43 = vsel %vm460_vm3, %v455_v53, %v1188_v39 }
 0x272   : > { %v563_v6 = vsel %vm174_vm9, %v551_v0, inf  ;;  %v564_v24 = vsel %vm175_vm12, %v555_v60, inf  ;;  %v520_v50 = vsel %vm168_vm6, %v511_v40, inf  ;;  %v507_v56 = vsel %vm505_vm4, %v1190_v42, %v500_v59 }
 0x273   : > { %v571_v20 = vmin.f32 %v526_v10, %v563_v6  ;;  %v572_v32 = vmin.f32 %v527_v27, %v564_v24  ;;  %v476_v53 = vsel %vm167_vm8, %v466_v43, inf  ;;  %v528_v57 = vmin.f32 %v483_v55, %v520_v50 }
 0x274   : > { %v545_v15 = vpop.permute.xlu1 %544  ;;  %v588_v16 = vpop.permute.xlu0 %587  ;;  %v521_v58 = vsel %vm169_vm10, %v507_v56, inf  ;;  %v484_v63 = vmin.f32 %v1126_v21, %v476_v53 }
 0x275   : > { %v596_v22 = vsel %vm595_vm11, %v580_v46, %v588_v16  ;;  %v600_v23 = vsel %vm595_vm11, %v588_v16, %v580_v46  ;;  %v552_v46 = vsel %vm550_vm7, %v1194_v45, %v545_v15  ;;  %v556_v42 = vsel %vm550_vm7, %v545_v15, %v1194_v45 }
 0x276   : > { %v608_v26 = vsel %vm176_vm13, %v600_v23, inf  ;;  %v609_v19 = vsel %vm177_vm14, %v596_v22, inf  ;;  %v565_v1 = vsel %vm174_vm9, %v552_v46, inf  ;;  %v566_v45 = vsel %vm175_vm12, %v556_v42, inf }
 0x277   : > { %v1251_v29 = vmin.f32 %v571_v20, %v608_v26  ;;  %v1262_v34 = vmin.f32 %v572_v32, %v609_v19  ;;  %v573_v0 = vmin.f32 %v528_v57, %v565_v1  ;;  %v529_v6 = vmin.f32 %v484_v63, %v521_v58 }
 0x278   : > { %v590_v14 = vpop.permute.xlu1 %589  ;;  %v449_v18 = vpop.permute.xlu0 %448 }
 0x279   : > { %714 = vrot.lane.b32.xlu1 %v1251_v29, %s1020_s29  ;;  %624 = vrot.lane.b32.xlu0 %v1251_v29, %s1021_s30  ;;  %v601_v39 = vsel %vm595_vm11, %v590_v14, %v1202_v49  ;;  %v597_v2 = vsel %vm595_vm11, %v1202_v49, %v590_v14  ;;  %v574_v15 = vmin.f32 %v529_v6, %v566_v45 }
 0x27a   : > { %v610_v59 = vsel %vm176_vm13, %v601_v39, inf  ;;  %v611_v21 = vsel %vm177_vm14, %v597_v2, inf }
 0x27b   : > { %v1319_v10 = vmin.f32 %v573_v0, %v610_v59  ;;  %v1329_v49 = vmin.f32 %v574_v15, %v611_v21 }
 0x27c   : > { %v1264_v35 = vpop.permute.xlu1 %450  ;;  %v494_v38 = vpop.permute.xlu0 %493 }
 0x27d   : > { %722 = vrot.lane.b32.xlu1 %v1262_v34, %s1020_s29  ;;  %632 = vrot.lane.b32.xlu0 %v1262_v34, %s1021_s30 }
 0x280   : > { %v1283_v52 = vpop.permute.xlu1 %495  ;;  %v539_v54 = vpop.permute.xlu0 %538 }
 0x281   : > { %759 = vrot.lane.b32.xlu1 %v1251_v29, %s1022_s3  ;;  %669 = vrot.lane.b32.xlu0 %v1251_v29, %s1023_s4 }
 0x284   : > { %v1307_v61 = vpop.permute.xlu1 %540  ;;  %v584_v62 = vpop.permute.xlu0 %583 }
 0x285   : > { %767 = vrot.lane.b32.xlu1 %v1262_v34, %s1022_s3  ;;  %677 = vrot.lane.b32.xlu0 %v1262_v34, %s1023_s4 }
 0x288   : > { %v1323_v60 = vpop.permute.xlu1 %585  ;;  %v457_v11 = vpop.permute.xlu0 %456 }
 0x289   : > { %626 = vrot.lane.b32.xlu1 %v1319_v10, %s1021_s30  ;;  %716 = vrot.lane.b32.xlu0 %v1319_v10, %s1020_s29  ;;  %v463_v16 = vsel %vm460_vm3, %v449_v18, %v457_v11  ;;  %v467_v24 = vsel %vm460_vm3, %v457_v11, %v449_v18 }
 0x28a   : > { %v477_v23 = vsel %vm166_vm5, %v463_v16, inf  ;;  %v478_v40 = vsel %vm167_vm8, %v467_v24, inf }
 0x28b   : > { %v485_v14 = vmin.f32 %v1140_v25, %v477_v23  ;;  %v486_v50 = vmin.f32 %v1161_v30, %v478_v40 }
 0x28c   : > { %v459_v17 = vpop.permute.xlu1 %458  ;;  %v502_v20 = vpop.permute.xlu0 %501 }
 0x28d   : > { %v512_v22 = vsel %vm505_vm4, %v502_v20, %v494_v38  ;;  %634 = vrot.lane.b32.xlu1 %v1329_v49, %s1021_s30  ;;  %724 = vrot.lane.b32.xlu0 %v1329_v49, %s1020_s29  ;;  %v508_v32 = vsel %vm505_vm4, %v494_v38, %v502_v20  ;;  %v464_v30 = vsel %vm460_vm3, %v1264_v35, %v459_v17 }
 0x28e   : > { %v522_v26 = vsel %vm168_vm6, %v512_v22, inf  ;;  %v523_v38 = vsel %vm169_vm10, %v508_v32, inf  ;;  %v468_v0 = vsel %vm460_vm3, %v459_v17, %v1264_v35  ;;  %vm172_vm3 = vcmp.ge.s32.totalorder %v1192_v44, 16 }
 0x28f   : > { %v530_v41 = vmin.f32 %v485_v14, %v522_v26  ;;  %v531_v1 = vmin.f32 %v486_v50, %v523_v38  ;;  %v480_v35 = vsel %vm167_vm8, %v468_v0, inf }
 0x290   : > { %v504_v27 = vpop.permute.xlu1 %503  ;;  %v547_v19 = vpop.permute.xlu0 %546  ;;  %v488_v22 = vmin.f32 %v1168_v31, %v480_v35 }
 0x291   : > { %v553_v33 = vsel %vm550_vm7, %v539_v54, %v547_v19  ;;  %671 = vrot.lane.b32.xlu1 %v1319_v10, %s1023_s4  ;;  %761 = vrot.lane.b32.xlu0 %v1319_v10, %s1022_s3  ;;  %v557_v25 = vsel %vm550_vm7, %v547_v19, %v539_v54  ;;  %v513_v58 = vsel %vm505_vm4, %v504_v27, %v1283_v52 }
 0x292   : > { %v567_v18 = vsel %vm174_vm9, %v553_v33, inf  ;;  %v568_v54 = vsel %vm175_vm12, %v557_v25, inf  ;;  %v524_v6 = vsel %vm168_vm6, %v513_v58, inf  ;;  %v509_v11 = vsel %vm505_vm4, %v1283_v52, %v504_v27 }
 0x293   : > { %v575_v55 = vmin.f32 %v530_v41, %v567_v18  ;;  %v576_v59 = vmin.f32 %v531_v1, %v568_v54  ;;  %v525_v17 = vsel %vm169_vm10, %v509_v11, inf  ;;  %vm179_vm4 = vcmp.lt.s32.totalorder %v1197_v47, 224 }
 0x294   : > { %v549_v43 = vpop.permute.xlu1 %548  ;;  %v592_v46 = vpop.permute.xlu0 %591  ;;  %vm180_vm6 = vcmp.ge.s32.totalorder %v1192_v44, 32 }
 0x295   : > { %v598_v56 = vsel %vm595_vm11, %v584_v62, %v592_v46  ;;  %v602_v39 = vsel %vm595_vm11, %v592_v46, %v584_v62  ;;  %679 = vrot.lane.b32.xlu1 %v1329_v49, %s1023_s4  ;;  %769 = vrot.lane.b32.xlu0 %v1329_v49, %s1022_s3  ;;  %v479_v62 = vsel %vm166_vm5, %v464_v30, inf  ;;  %v554_v2 = vsel %vm550_vm7, %v1307_v61, %v549_v43 }
 0x296   : > { %v612_v53 = vsel %vm176_vm13, %v602_v39, inf  ;;  %v613_v42 = vsel %vm177_vm14, %v598_v56, inf  ;;  %v487_v21 = vmin.f32 %v1146_v28, %v479_v62  ;;  %v569_v16 = vsel %vm174_vm9, %v554_v2, inf }
 0x297   : > { %v1378_v57 = vmin.f32 %v575_v55, %v612_v53  ;;  %v1397_v45 = vmin.f32 %v576_v59, %v613_v42  ;;  %v558_v52 = vsel %vm550_vm7, %v549_v43, %v1307_v61  ;;  %v533_v61 = vmin.f32 %v488_v22, %v525_v17 }
 0x298   : > { %v594_v63 = vpop.permute.xlu1 %593  ;;  %v532_v28 = vmin.f32 %v487_v21, %v524_v6  ;;  %v570_v26 = vsel %vm175_vm12, %v558_v52, inf  ;;  %vm775_vm5 = vcmp.lt.s32.totalorder %v1192_v44, 32 }
 0x299   : > { %718 = vrot.lane.b32.xlu1 %v1378_v57, %s1020_s29  ;;  %628 = vrot.lane.b32.xlu0 %v1378_v57, %s1021_s30  ;;  %v603_v15 = vsel %vm595_vm11, %v594_v63, %v1323_v60  ;;  %v599_v24 = vsel %vm595_vm11, %v1323_v60, %v594_v63  ;;  %v578_v48 = vmin.f32 %v533_v61, %v570_v26 }
 0x29a   : > { %v614_v20 = vsel %vm176_vm13, %v603_v15, inf  ;;  %v577_v23 = vmin.f32 %v532_v28, %v569_v16  ;;  %v615_v31 = vsel %vm177_vm14, %v599_v24, inf }
 0x29b   : > { %v1441_v60 = vmin.f32 %v578_v48, %v615_v31 }
 0x29c   : > { %v1433_v27 = vmin.f32 %v577_v23, %v614_v20 }
 0x29d   : > { %726 = vrot.lane.b32.xlu1 %v1397_v45, %s1020_s29  ;;  %636 = vrot.lane.b32.xlu0 %v1397_v45, %s1021_s30 }
 0x2a1   : > { %763 = vrot.lane.b32.xlu1 %v1378_v57, %s1022_s3  ;;  %673 = vrot.lane.b32.xlu0 %v1378_v57, %s1023_s4 }
 0x2a5   : > { %630 = vrot.lane.b32.xlu1 %v1433_v27, %s1021_s30  ;;  %681 = vrot.lane.b32.xlu0 %v1397_v45, %s1023_s4  ;;  %v1459_v51 = vpop.permute.xlu0 %821 }
 0x2a9   : > { %638 = vrot.lane.b32.xlu1 %v1441_v60, %s1021_s30  ;;  %720 = vrot.lane.b32.xlu0 %v1433_v27, %s1020_s29  ;;  %v1461_v19 = vpop.permute.xlu1 %816 }
 0x2ad   : > { %675 = vrot.lane.b32.xlu1 %v1433_v27, %s1023_s4  ;;  %728 = vrot.lane.b32.xlu0 %v1441_v60, %s1020_s29 }
 0x2b1   : > { %683 = vrot.lane.b32.xlu1 %v1441_v60, %s1023_s4  ;;  %765 = vrot.lane.b32.xlu0 %v1433_v27, %s1022_s3 }
 0x2b5   : > { %771 = vrot.lane.b32.xlu1 %v1397_v45, %s1022_s3  ;;  %773 = vrot.lane.b32.xlu0 %v1441_v60, %s1022_s3 }
 0x2eb   : > { %v715_v14 = vpop.permute.xlu1 %714  ;;  %v625_v32 = vpop.permute.xlu0 %624 }
 0x2ef   : > { %v723_v33 = vpop.permute.xlu1 %722  ;;  %v633_v40 = vpop.permute.xlu0 %632 }
 0x2f0   : > { %v645_v18 = vsel %vm640_vm15, %v633_v40, %v625_v32  ;;  %v641_v43 = vsel %vm640_vm15, %v625_v32, %v633_v40  ;;  %v735_v46 = vsel %vm730_vm1, %v723_v33, %v715_v14  ;;  %v731_v58 = vsel %vm730_vm1, %v715_v14, %v723_v33 }
 0x2f1   : > { %v654_v38 = vsel %vm171_vm0, %v645_v18, inf  ;;  %v661_v39 = vmin.f32 %v1251_v29, %v641_v43 }
 0x2f2   : > { %v662_v50 = vmin.f32 %v1262_v34, %v654_v38  ;;  %v744_v34 = vsel %vm179_vm4, %v735_v46, inf }
 0x2f3   : > { %v760_v41 = vpop.permute.xlu1 %759  ;;  %v670_v25 = vpop.permute.xlu0 %669 }
 0x2f7   : > { %v768_v55 = vpop.permute.xlu1 %767  ;;  %v678_v56 = vpop.permute.xlu0 %677 }
 0x2f8   : > { %v686_v54 = vsel %vm685_vm2, %v670_v25, %v678_v56  ;;  %v690_v53 = vsel %vm685_vm2, %v678_v56, %v670_v25  ;;  %v780_v42 = vsel %vm775_vm5, %v768_v55, %v760_v41  ;;  %v776_v0 = vsel %vm775_vm5, %v760_v41, %v768_v55 }
 0x2f9   : > { %v698_v30 = vsel %vm172_vm3, %v690_v53, inf  ;;  %v707_v1 = vmin.f32 %v662_v50, %v686_v54  ;;  %v788_v6 = vsel %vm180_vm6, %v780_v42, inf }
 0x2fa   : > { %v706_v29 = vmin.f32 %v661_v39, %v698_v30 }
 0x2fb   : > { %v752_v59 = vmin.f32 %v707_v1, %v744_v34  ;;  %v627_v62 = vpop.permute.xlu1 %626  ;;  %v717_v63 = vpop.permute.xlu0 %716 }
 0x2fc   : > { %v751_v2 = vmin.f32 %v706_v29, %v731_v58 }
 0x2fd   : > { %v797_v21 = vmin.f32 %v752_v59, %v776_v0 }
 0x2fe   : > { %v796_v11 = vmin.f32 %v751_v2, %v788_v6 }
 0x2ff   : > { %v825_v15 = vmul.f32 %v1184_v36, %v797_v21  ;;  %v635_v35 = vpop.permute.xlu1 %634  ;;  %v725_v28 = vpop.permute.xlu0 %724 }
 0x300   : > { %v824_v16 = vmul.f32 %v1184_v36, %v796_v11  ;;  %v646_v17 = vsel %vm640_vm15, %v635_v35, %v627_v62  ;;  %v642_v26 = vsel %vm640_vm15, %v627_v62, %v635_v35 }
 0x301   : > { %v833_v52 = vmul.f32 %v825_v15, %v1058_v3  ;;  %v656_v23 = vsel %vm171_vm0, %v646_v17, inf  ;;  %v736_v3 = vsel %vm730_vm1, %v725_v28, %v717_v63  ;;  %v663_v31 = vmin.f32 %v1319_v10, %v642_v26 }
 0x302   : > { %v832_v20 = vmul.f32 %v824_v16, %v1062_v5  ;;  %v664_v36 = vmin.f32 %v1329_v49, %v656_v23  ;;  %v746_v49 = vsel %vm179_vm4, %v736_v3, inf  ;;  %v732_v10 = vsel %vm730_vm1, %v717_v63, %v725_v28 }
 0x303   : > { %841 = vst [vmem:[%s1503_s7 + $0x8] sm:$0xff] %v833_v52  ;;  %v672_v22 = vpop.permute.xlu1 %671  ;;  %v762_v24 = vpop.permute.xlu0 %761 }
 0x304   : > { %840 = vst [vmem:[%s1503_s7] sm:$0xff] %v832_v20 }
 0x307   : > { %v680_v61 = vpop.permute.xlu1 %679  ;;  %v770_v14 = vpop.permute.xlu0 %769 }
 0x308   : > { %v687_v5 = vsel %vm685_vm2, %v672_v22, %v680_v61  ;;  %v691_v48 = vsel %vm685_vm2, %v680_v61, %v672_v22  ;;  %v781_v18 = vsel %vm775_vm5, %v770_v14, %v762_v24  ;;  %v777_v43 = vsel %vm775_vm5, %v762_v24, %v770_v14 }
 0x309   : > { %v700_v32 = vsel %vm172_vm3, %v691_v48, inf  ;;  %v709_v33 = vmin.f32 %v664_v36, %v687_v5  ;;  %v790_v50 = vsel %vm180_vm6, %v781_v18, inf }
 0x30a   : > { %v708_v40 = vmin.f32 %v663_v31, %v700_v32 }
 0x30b   : > { %v754_v41 = vmin.f32 %v709_v33, %v746_v49  ;;  %v719_v25 = vpop.permute.xlu1 %718  ;;  %v629_v46 = vpop.permute.xlu0 %628 }
 0x30c   : > { %v753_v38 = vmin.f32 %v708_v40, %v732_v10 }
 0x30d   : > { %v799_v55 = vmin.f32 %v754_v41, %v777_v43 }
 0x30e   : > { %v798_v56 = vmin.f32 %v753_v38, %v790_v50 }
 0x30f   : > { %v827_v39 = vmul.f32 %v1186_v37, %v799_v55  ;;  %v727_v54 = vpop.permute.xlu1 %726  ;;  %v637_v30 = vpop.permute.xlu0 %636 }
 0x310   : > { %v826_v53 = vmul.f32 %v1186_v37, %v798_v56  ;;  %v647_v62 = vsel %vm640_vm15, %v637_v30, %v629_v46  ;;  %v737_v17 = vsel %vm730_vm1, %v727_v54, %v719_v25 }
 0x311   : > { %v835_v1 = vmul.f32 %v827_v39, %v1060_v4  ;;  %v658_v37 = vsel %vm171_vm0, %v647_v62, inf }
 0x312   : > { %v834_v34 = vmul.f32 %v826_v53, %v1066_v7  ;;  %v643_v7 = vsel %vm640_vm15, %v629_v46, %v637_v30  ;;  %v666_v35 = vmin.f32 %v1397_v45, %v658_v37 }
 0x313   : > { %843 = vst [vmem:[%s1503_s7 + $0x18] sm:$0xff] %v835_v1  ;;  %v764_v42 = vpop.permute.xlu1 %763  ;;  %v674_v29 = vpop.permute.xlu0 %673  ;;  %v665_v52 = vmin.f32 %v1378_v57, %v643_v7 }
 0x314   : > { %842 = vst [vmem:[%s1503_s7 + $0x10] sm:$0xff] %v834_v34 }
 0x317   : > { %v631_v58 = vpop.permute.xlu1 %630  ;;  %v682_v59 = vpop.permute.xlu0 %681 }
 0x318   : > { %v692_v4 = vsel %vm685_vm2, %v682_v59, %v674_v29  ;;  %v688_v21 = vsel %vm685_vm2, %v674_v29, %v682_v59 }
 0x319   : > { %v702_v16 = vsel %vm172_vm3, %v692_v4, inf  ;;  %v711_v20 = vmin.f32 %v666_v35, %v688_v21 }
 0x31a   : > { %v710_v26 = vmin.f32 %v665_v52, %v702_v16 }
 0x31b   : > { %v639_v63 = vpop.permute.xlu1 %638  ;;  %v721_v0 = vpop.permute.xlu0 %720 }
 0x31c   : > { %v648_v2 = vsel %vm640_vm15, %v639_v63, %v631_v58  ;;  %v644_v28 = vsel %vm640_vm15, %v631_v58, %v639_v63 }
 0x31d   : > { %v660_v11 = vsel %vm171_vm0, %v648_v2, inf  ;;  %v667_v45 = vmin.f32 %v1433_v27, %v644_v28  ;;  %v733_v27 = vsel %vm730_vm1, %v719_v25, %v727_v54 }
 0x31e   : > { %v668_v22 = vmin.f32 %v1441_v60, %v660_v11  ;;  %v748_v60 = vsel %vm179_vm4, %v737_v17, inf  ;;  %v755_v40 = vmin.f32 %v710_v26, %v733_v27 }
 0x31f   : > { %v676_v6 = vpop.permute.xlu1 %675  ;;  %v729_v15 = vpop.permute.xlu0 %728  ;;  %v756_v33 = vmin.f32 %v711_v20, %v748_v60 }
 0x320   : > { %v738_v23 = vsel %vm730_vm1, %v729_v15, %v721_v0  ;;  %v734_v14 = vsel %vm730_vm1, %v721_v0, %v729_v15 }
 0x321   : > { %v750_v5 = vsel %vm179_vm4, %v738_v23, inf }
 0x323   : > { %v684_v24 = vpop.permute.xlu1 %683  ;;  %v766_v57 = vpop.permute.xlu0 %765 }
 0x324   : > { %v689_v36 = vsel %vm685_vm2, %v676_v6, %v684_v24  ;;  %v693_v3 = vsel %vm685_vm2, %v684_v24, %v676_v6 }
 0x325   : > { %v704_v61 = vsel %vm172_vm3, %v693_v3, inf  ;;  %v713_v31 = vmin.f32 %v668_v22, %v689_v36 }
 0x326   : > { %v712_v48 = vmin.f32 %v667_v45, %v704_v61 }
 0x327   : > { %v772_v32 = vpop.permute.xlu1 %771  ;;  %v758_v49 = vmin.f32 %v713_v31, %v750_v5  ;;  %v774_v47 = vpop.permute.xlu0 %773 }
 0x328   : > { %v778_v18 = vsel %vm775_vm5, %v764_v42, %v772_v32  ;;  %v782_v10 = vsel %vm775_vm5, %v772_v32, %v764_v42  ;;  %v757_v41 = vmin.f32 %v712_v48, %v734_v14  ;;  %v779_v43 = vsel %vm775_vm5, %v766_v57, %v774_v47 }
 0x329   : > { %v792_v38 = vsel %vm180_vm6, %v782_v10, inf  ;;  %v801_v25 = vmin.f32 %v756_v33, %v778_v18  ;;  %v783_v46 = vsel %vm775_vm5, %v774_v47, %v766_v57  ;;  %v803_v56 = vmin.f32 %v758_v49, %v779_v43 }
 0x32a   : > { %v800_v50 = vmin.f32 %v755_v40, %v792_v38  ;;  %v794_v55 = vsel %vm180_vm6, %v783_v46, inf }
 0x32b   : > { %v829_v39 = vmul.f32 %v1461_v19, %v801_v25  ;;  %v802_v54 = vmin.f32 %v757_v41, %v794_v55  ;;  %v831_v30 = vmul.f32 %v1459_v51, %v803_v56 }
 0x32c   : > { %v828_v53 = vmul.f32 %v1461_v19, %v800_v50 }
 0x32d   : > { %v837_v1 = vmul.f32 %v829_v39, %v1068_v8  ;;  %v830_v34 = vmul.f32 %v1459_v51, %v802_v54  ;;  %v839_v29 = vmul.f32 %v831_v30, %v1070_v9 }
 0x32e   : > { %v836_v42 = vmul.f32 %v828_v53, %v1076_v12 }
 0x32f   : > { %845 = vst [vmem:[%s1503_s7 + $0x28] sm:$0xff] %v837_v1  ;;  %v838_v44 = vmul.f32 %v830_v34, %v1078_v13  ;;  %847 = vst [vmem:[%s1503_s7 + $0x38] sm:$0xff] %v839_v29 }
 0x330   : > { %844 = vst [vmem:[%s1503_s7 + $0x20] sm:$0xff] %v836_v42 }
 0x331   : > { %846 = vst [vmem:[%s1503_s7 + $0x30] sm:$0xff] %v838_v44 }
 0x332 PF: > { %s12_s9 = sadd.s32 1, %s1010_s9  }
 0x333   : > { %p9_p4 = scmp.ge.s32.totalorder %s12_s9, 4  }
 0x335   :  { %11 = sbr.rel (!%p9_p4) target bundleno = 1 (0x1), region = 58 }

</bundles_post_ra>
